<compile_context>
chip_gen: v6e
topology: v6e:2x2x1
jax: 0.10.0
libtpu: 0.0.40
codegen_flags: <defaults>
</compile_context>

<pallas_src>
import jax
import jax.numpy as jnp
from jax.experimental import pallas as pl
from jax.experimental.pallas import tpu as pltpu

# ----- synthetic config (mirrors cfg.* used by the PyTorch code) -----
DEPTH_DIM = 8            # cfg.depth_dim
OUTPUT_SHAPE = (8, 8)    # cfg.output_shape = (H, W)
JOINT_NUM = 4
IN_CHANNELS = 4
BATCH = 2

_OUT_LANES = 128         # lane-dense output slab width


# --------------------------------------------------------------------------
# Fused kernel: 1x1-conv backbone (VPU FMAs) + soft_argmax (exp + weighted
# coordinate reductions), everything resident in VMEM/vregs.
# --------------------------------------------------------------------------
def _custom_net_kernel(x_ref, w_ref, cw_ref, cz_ref, o_ref):
    """Fused backbone + soft_argmax.

    x_ref : (Cin, B, 1, 1, HW)  input image, channel-major
    w_ref : (Cin, 1, J, D, 1)   1x1-conv weight, channel-major
    cw_ref: (2, 1, 1, HW)       f32 coord weights: row0 = hw % W, row1 = hw // W
    cz_ref: (1, 1, D)           f32 depth coord weights: arange(D)
    o_ref : (B, J, 128)         lanes 0..2 hold (x, y, z) expected coordinates
    """
    cin = x_ref.shape[0]

    # ---- backbone 1x1 conv as Cin broadcast multiply-adds (VPU, not MXU) ----
    hm = w_ref[0] * x_ref[0]                       # (B, J, D, HW)
    for c in range(1, cin):
        hm = hm + w_ref[c] * x_ref[c]

    # ---- soft_argmax: stabilized exp, un-normalized weighted sums ----------
    m = jnp.max(hm, axis=3, keepdims=True)
    m = jnp.max(m, axis=2, keepdims=True)          # (B, J, 1, 1)
    e = jnp.exp(hm - m)                            # (B, J, D, HW)

    wx = cw_ref[0]                                 # (1, 1, HW)
    wy = cw_ref[1]                                 # (1, 1, HW)
    ez = jnp.sum(e, axis=3)                        # (B, J, D)  reused below
    sx = jnp.sum(jnp.sum(e * wx, axis=3), axis=2, keepdims=True)   # (B, J, 1)
    sy = jnp.sum(jnp.sum(e * wy, axis=3), axis=2, keepdims=True)   # (B, J, 1)
    s  = jnp.sum(ez, axis=2, keepdims=True)                        # (B, J, 1)
    sz = jnp.sum(ez * cz_ref[...], axis=2, keepdims=True)          # (B, J, 1)

    # Only B*J scalar divides (exact, keeps 1e-4 accuracy vs. the reference).
    inv = 1.0 / s                                  # (B, J, 1)

    # Lane-dense output: single unmasked (B, J, 128) store; wrapper slices :3.
    lane = jax.lax.broadcasted_iota(jnp.int32, o_ref.shape, 2)
    num = (jnp.where(lane == 0, sx, 0.0)
           + jnp.where(lane == 1, sy, 0.0)
           + jnp.where(lane == 2, sz, 0.0))        # (B, J, 128)
    o_ref[...] = num * inv


# --------------------------------------------------------------------------
# CustomNet.forward
# --------------------------------------------------------------------------
def custom_net_forward(input_img, backbone_weight, joint_num,
                       depth_dim=DEPTH_DIM, output_shape=OUTPUT_SHAPE,
                       target=None):
    """input_img: (B, Cin, H, W); backbone_weight: (joint_num*depth_dim, Cin)."""
    B, Cin, H, W = input_img.shape
    J, D = joint_num, depth_dim
    assert (H, W) == tuple(output_shape)
    assert backbone_weight.shape == (J * D, Cin)
    HW = H * W

    # Layout prep in plain XLA (tiny; weight/coord tables constant-fold under jit).
    xk = jnp.transpose(input_img.astype(jnp.float32).reshape(B, Cin, HW),
                       (1, 0, 2)).reshape(Cin, B, 1, 1, HW)
    wk = jnp.transpose(backbone_weight.astype(jnp.float32).reshape(J, D, Cin),
                       (2, 0, 1)).reshape(Cin, 1, J, D, 1)
    hw_idx = jnp.arange(HW, dtype=jnp.int32)
    cw = jnp.stack([hw_idx % W, hw_idx // W]).astype(jnp.float32)
    cw = cw.reshape(2, 1, 1, HW)
    cz = jnp.arange(D, dtype=jnp.float32).reshape(1, 1, D)

    out = pl.pallas_call(
        _custom_net_kernel,
        out_shape=jax.ShapeDtypeStruct((B, J, _OUT_LANES), jnp.float32),
        grid=(1,),
        in_specs=[
            pl.BlockSpec((Cin, B, 1, 1, HW), lambda i: (0, 0, 0, 0, 0)),
            pl.BlockSpec((Cin, 1, J, D, 1), lambda i: (0, 0, 0, 0, 0)),
            pl.BlockSpec((2, 1, 1, HW), lambda i: (0, 0, 0, 0)),
            pl.BlockSpec((1, 1, D), lambda i: (0, 0, 0)),
        ],
        out_specs=pl.BlockSpec((B, J, _OUT_LANES), lambda i: (0, 0, 0)),
        compiler_params=pltpu.CompilerParams(
            dimension_semantics=("arbitrary",)),
    )(xk, wk, cw, cz)

    coord = out[:, :, :3]                           # (B, J, 3)
    if target is None:
        return coord
    # training-loss branch (trivial elementwise glue, kept in plain JAX)
    loss_coord = jnp.abs(coord - target['coord']) * target['vis']
    loss_coord = (loss_coord[:, :, 0] + loss_coord[:, :, 1]
                  + loss_coord[:, :, 2] * target['have_depth']) / 3.0
    return loss_coord


if __name__ == "__main__":
    key = jax.random.PRNGKey(0)
    k1, k2 = jax.random.split(key)
    H, W = OUTPUT_SHAPE
    x = jax.random.normal(k1, (BATCH, IN_CHANNELS, H, W), dtype=jnp.float32)
    cout = JOINT_NUM * DEPTH_DIM
    w = 0.1 * jax.random.normal(k2, (cout, IN_CHANNELS), dtype=jnp.float32)

    coord = jax.block_until_ready(custom_net_forward(x, w, JOINT_NUM))

    # pure-JAX reference of the same forward pass (PyTorch semantics)
    fm_ref = jnp.einsum('bchw,oc->bohw', x, w)
    p = jax.nn.softmax(fm_ref.reshape(BATCH, JOINT_NUM, -1), axis=-1)
    p = p.reshape(BATCH, JOINT_NUM, DEPTH_DIM, H, W)
    ax = (p.sum(axis=(2, 3)) * jnp.arange(1, W + 1)).sum(-1) - 1.0
    ay = (p.sum(axis=(2, 4)) * jnp.arange(1, H + 1)).sum(-1) - 1.0
    az = (p.sum(axis=(3, 4)) * jnp.arange(1, DEPTH_DIM + 1)).sum(-1) - 1.0
    ref = jnp.stack([ax, ay, az], axis=-1)

    assert coord.shape == (BATCH, JOINT_NUM, 3)
    assert jnp.allclose(coord, ref, atol=1e-4, rtol=1e-4)
    print("KERNEL_OK")
</pallas_src>

<mosaic_0001>
module attributes {stable_mosaic.version = 11 : i64} {
  func.func @_custom_net_kernel(%arg0: i32, %arg1: memref<4x2x1x1x64xf32, #tpu.memory_space<vmem>>, %arg2: memref<4x1x4x8x1xf32, #tpu.memory_space<vmem>>, %arg3: memref<2x1x1x64xf32, #tpu.memory_space<vmem>>, %arg4: memref<1x1x8xf32, #tpu.memory_space<vmem>>, %arg5: memref<2x4x128xf32, #tpu.memory_space<vmem>>) attributes {dimension_semantics = [#tpu.dimension_semantics<arbitrary>], iteration_bounds = array<i64: 1>, scalar_prefetch = 0 : i64, scratch_operands = 0 : i64, tpu.core_type = #tpu.core_type<tc>, window_params = [{pipeline_mode = #tpu.pipeline_mode<synchronous>, transform_indices = @transform_0, window_bounds = array<i64: 4, 2, 1, 1, 64>}, {pipeline_mode = #tpu.pipeline_mode<synchronous>, transform_indices = @transform_1, window_bounds = array<i64: 4, 1, 4, 8, 1>}, {pipeline_mode = #tpu.pipeline_mode<synchronous>, transform_indices = @transform_2, window_bounds = array<i64: 2, 1, 1, 64>}, {pipeline_mode = #tpu.pipeline_mode<synchronous>, transform_indices = @transform_3, window_bounds = array<i64: 1, 1, 8>}, {pipeline_mode = #tpu.pipeline_mode<synchronous>, transform_indices = @transform_4, window_bounds = array<i64: 2, 4, 128>}]} {
    %c0 = arith.constant 0 : index
    %c0_0 = arith.constant 0 : index
    %c0_1 = arith.constant 0 : index
    %c0_2 = arith.constant 0 : index
    %c0_3 = arith.constant 0 : index
    %0 = vector.load %arg2[%c0, %c0_0, %c0_1, %c0_2, %c0_3] : memref<4x1x4x8x1xf32, #tpu.memory_space<vmem>>, vector<1x1x4x8x1xf32>
    %1 = vector.shape_cast %0 : vector<1x1x4x8x1xf32> to vector<1x4x8x1xf32>
    %c0_4 = arith.constant 0 : index
    %c0_5 = arith.constant 0 : index
    %c0_6 = arith.constant 0 : index
    %c0_7 = arith.constant 0 : index
    %c0_8 = arith.constant 0 : index
    %2 = vector.load %arg1[%c0_4, %c0_5, %c0_6, %c0_7, %c0_8] : memref<4x2x1x1x64xf32, #tpu.memory_space<vmem>>, vector<1x2x1x1x64xf32>
    %3 = vector.shape_cast %2 : vector<1x2x1x1x64xf32> to vector<2x1x1x64xf32>
    %4 = vector.broadcast %1 : vector<1x4x8x1xf32> to vector<2x4x8x64xf32>
    %5 = vector.broadcast %3 : vector<2x1x1x64xf32> to vector<2x4x8x64xf32>
    %6 = arith.mulf %4, %5 : vector<2x4x8x64xf32>
    %c1 = arith.constant 1 : index
    %c0_9 = arith.constant 0 : index
    %c0_10 = arith.constant 0 : index
    %c0_11 = arith.constant 0 : index
    %c0_12 = arith.constant 0 : index
    %7 = vector.load %arg2[%c1, %c0_9, %c0_10, %c0_11, %c0_12] : memref<4x1x4x8x1xf32, #tpu.memory_space<vmem>>, vector<1x1x4x8x1xf32>
    %8 = vector.shape_cast %7 : vector<1x1x4x8x1xf32> to vector<1x4x8x1xf32>
    %c1_13 = arith.constant 1 : index
    %c0_14 = arith.constant 0 : index
    %c0_15 = arith.constant 0 : index
    %c0_16 = arith.constant 0 : index
    %c0_17 = arith.constant 0 : index
    %9 = vector.load %arg1[%c1_13, %c0_14, %c0_15, %c0_16, %c0_17] : memref<4x2x1x1x64xf32, #tpu.memory_space<vmem>>, vector<1x2x1x1x64xf32>
    %10 = vector.shape_cast %9 : vector<1x2x1x1x64xf32> to vector<2x1x1x64xf32>
    %11 = vector.broadcast %8 : vector<1x4x8x1xf32> to vector<2x4x8x64xf32>
    %12 = vector.broadcast %10 : vector<2x1x1x64xf32> to vector<2x4x8x64xf32>
    %13 = arith.mulf %11, %12 : vector<2x4x8x64xf32>
    %14 = arith.addf %6, %13 : vector<2x4x8x64xf32>
    %c2 = arith.constant 2 : index
    %c0_18 = arith.constant 0 : index
    %c0_19 = arith.constant 0 : index
    %c0_20 = arith.constant 0 : index
    %c0_21 = arith.constant 0 : index
    %15 = vector.load %arg2[%c2, %c0_18, %c0_19, %c0_20, %c0_21] : memref<4x1x4x8x1xf32, #tpu.memory_space<vmem>>, vector<1x1x4x8x1xf32>
    %16 = vector.shape_cast %15 : vector<1x1x4x8x1xf32> to vector<1x4x8x1xf32>
    %c2_22 = arith.constant 2 : index
    %c0_23 = arith.constant 0 : index
    %c0_24 = arith.constant 0 : index
    %c0_25 = arith.constant 0 : index
    %c0_26 = arith.constant 0 : index
    %17 = vector.load %arg1[%c2_22, %c0_23, %c0_24, %c0_25, %c0_26] : memref<4x2x1x1x64xf32, #tpu.memory_space<vmem>>, vector<1x2x1x1x64xf32>
    %18 = vector.shape_cast %17 : vector<1x2x1x1x64xf32> to vector<2x1x1x64xf32>
    %19 = vector.broadcast %16 : vector<1x4x8x1xf32> to vector<2x4x8x64xf32>
    %20 = vector.broadcast %18 : vector<2x1x1x64xf32> to vector<2x4x8x64xf32>
    %21 = arith.mulf %19, %20 : vector<2x4x8x64xf32>
    %22 = arith.addf %14, %21 : vector<2x4x8x64xf32>
    %c3 = arith.constant 3 : index
    %c0_27 = arith.constant 0 : index
    %c0_28 = arith.constant 0 : index
    %c0_29 = arith.constant 0 : index
    %c0_30 = arith.constant 0 : index
    %23 = vector.load %arg2[%c3, %c0_27, %c0_28, %c0_29, %c0_30] : memref<4x1x4x8x1xf32, #tpu.memory_space<vmem>>, vector<1x1x4x8x1xf32>
    %24 = vector.shape_cast %23 : vector<1x1x4x8x1xf32> to vector<1x4x8x1xf32>
    %c3_31 = arith.constant 3 : index
    %c0_32 = arith.constant 0 : index
    %c0_33 = arith.constant 0 : index
    %c0_34 = arith.constant 0 : index
    %c0_35 = arith.constant 0 : index
    %25 = vector.load %arg1[%c3_31, %c0_32, %c0_33, %c0_34, %c0_35] : memref<4x2x1x1x64xf32, #tpu.memory_space<vmem>>, vector<1x2x1x1x64xf32>
    %26 = vector.shape_cast %25 : vector<1x2x1x1x64xf32> to vector<2x1x1x64xf32>
    %27 = vector.broadcast %24 : vector<1x4x8x1xf32> to vector<2x4x8x64xf32>
    %28 = vector.broadcast %26 : vector<2x1x1x64xf32> to vector<2x4x8x64xf32>
    %29 = arith.mulf %27, %28 : vector<2x4x8x64xf32>
    %30 = arith.addf %22, %29 : vector<2x4x8x64xf32>
    %cst = arith.constant dense<0xFF800000> : vector<2x4x8xf32>
    %31 = vector.multi_reduction <maximumf>, %30, %cst [3] : vector<2x4x8x64xf32> to vector<2x4x8xf32>
    %32 = vector.shape_cast %31 : vector<2x4x8xf32> to vector<2x4x8x1xf32>
    %cst_36 = arith.constant dense<0xFF800000> : vector<2x4x1xf32>
    %33 = vector.multi_reduction <maximumf>, %32, %cst_36 [2] : vector<2x4x8x1xf32> to vector<2x4x1xf32>
    %34 = vector.shape_cast %33 : vector<2x4x1xf32> to vector<2x4x1x1xf32>
    %35 = vector.broadcast %34 : vector<2x4x1x1xf32> to vector<2x4x8x64xf32>
    %36 = arith.subf %30, %35 : vector<2x4x8x64xf32>
    %37 = math.exp %36 : vector<2x4x8x64xf32>
    %c0_37 = arith.constant 0 : index
    %c0_38 = arith.constant 0 : index
    %c0_39 = arith.constant 0 : index
    %c0_40 = arith.constant 0 : index
    %38 = vector.load %arg3[%c0_37, %c0_38, %c0_39, %c0_40] : memref<2x1x1x64xf32, #tpu.memory_space<vmem>>, vector<1x1x1x64xf32>
    %39 = vector.shape_cast %38 : vector<1x1x1x64xf32> to vector<1x1x64xf32>
    %c1_41 = arith.constant 1 : index
    %c0_42 = arith.constant 0 : index
    %c0_43 = arith.constant 0 : index
    %c0_44 = arith.constant 0 : index
    %40 = vector.load %arg3[%c1_41, %c0_42, %c0_43, %c0_44] : memref<2x1x1x64xf32, #tpu.memory_space<vmem>>, vector<1x1x1x64xf32>
    %41 = vector.shape_cast %40 : vector<1x1x1x64xf32> to vector<1x1x64xf32>
    %cst_45 = arith.constant dense<0.000000e+00> : vector<2x4x8xf32>
    %42 = vector.multi_reduction <add>, %37, %cst_45 [3] : vector<2x4x8x64xf32> to vector<2x4x8xf32>
    %43 = vector.shape_cast %39 : vector<1x1x64xf32> to vector<1x1x1x64xf32>
    %44 = vector.broadcast %43 : vector<1x1x1x64xf32> to vector<2x4x8x64xf32>
    %45 = arith.mulf %37, %44 : vector<2x4x8x64xf32>
    %cst_46 = arith.constant dense<0.000000e+00> : vector<2x4x8xf32>
    %46 = vector.multi_reduction <add>, %45, %cst_46 [3] : vector<2x4x8x64xf32> to vector<2x4x8xf32>
    %cst_47 = arith.constant dense<0.000000e+00> : vector<2x4xf32>
    %47 = vector.multi_reduction <add>, %46, %cst_47 [2] : vector<2x4x8xf32> to vector<2x4xf32>
    %48 = vector.shape_cast %47 : vector<2x4xf32> to vector<2x4x1xf32>
    %49 = vector.shape_cast %41 : vector<1x1x64xf32> to vector<1x1x1x64xf32>
    %50 = vector.broadcast %49 : vector<1x1x1x64xf32> to vector<2x4x8x64xf32>
    %51 = arith.mulf %37, %50 : vector<2x4x8x64xf32>
    %cst_48 = arith.constant dense<0.000000e+00> : vector<2x4x8xf32>
    %52 = vector.multi_reduction <add>, %51, %cst_48 [3] : vector<2x4x8x64xf32> to vector<2x4x8xf32>
    %cst_49 = arith.constant dense<0.000000e+00> : vector<2x4xf32>
    %53 = vector.multi_reduction <add>, %52, %cst_49 [2] : vector<2x4x8xf32> to vector<2x4xf32>
    %54 = vector.shape_cast %53 : vector<2x4xf32> to vector<2x4x1xf32>
    %cst_50 = arith.constant dense<0.000000e+00> : vector<2x4xf32>
    %55 = vector.multi_reduction <add>, %42, %cst_50 [2] : vector<2x4x8xf32> to vector<2x4xf32>
    %56 = vector.shape_cast %55 : vector<2x4xf32> to vector<2x4x1xf32>
    %c0_51 = arith.constant 0 : index
    %c0_52 = arith.constant 0 : index
    %c0_53 = arith.constant 0 : index
    %57 = vector.load %arg4[%c0_51, %c0_52, %c0_53] : memref<1x1x8xf32, #tpu.memory_space<vmem>>, vector<1x1x8xf32>
    %58 = vector.broadcast %57 : vector<1x1x8xf32> to vector<2x4x8xf32>
    %59 = arith.mulf %42, %58 : vector<2x4x8xf32>
    %cst_54 = arith.constant dense<0.000000e+00> : vector<2x4xf32>
    %60 = vector.multi_reduction <add>, %59, %cst_54 [2] : vector<2x4x8xf32> to vector<2x4xf32>
    %61 = vector.shape_cast %60 : vector<2x4xf32> to vector<2x4x1xf32>
    %cst_55 = arith.constant 1.000000e+00 : f32
    %62 = vector.broadcast %cst_55 : f32 to vector<2x4x1xf32>
    %63 = arith.divf %62, %56 : vector<2x4x1xf32>
    %64 = tpu.iota {dimensions = array<i32: 2>} : vector<2x4x128xi32>
    %c0_i32 = arith.constant 0 : i32
    %65 = vector.broadcast %c0_i32 : i32 to vector<2x4x128xi32>
    %66 = arith.cmpi eq, %64, %65 : vector<2x4x128xi32>
    %cst_56 = arith.constant 0.000000e+00 : f32
    %67 = vector.shape_cast %48 : vector<2x4x1xf32> to vector<2x4x1xf32>
    %68 = vector.broadcast %67 : vector<2x4x1xf32> to vector<2x4x128xf32>
    %69 = vector.broadcast %cst_56 : f32 to vector<2x4x128xf32>
    %70 = arith.select %66, %68, %69 : vector<2x4x128xi1>, vector<2x4x128xf32>
    %c1_i32 = arith.constant 1 : i32
    %71 = vector.broadcast %c1_i32 : i32 to vector<2x4x128xi32>
    %72 = arith.cmpi eq, %64, %71 : vector<2x4x128xi32>
    %cst_57 = arith.constant 0.000000e+00 : f32
    %73 = vector.shape_cast %54 : vector<2x4x1xf32> to vector<2x4x1xf32>
    %74 = vector.broadcast %73 : vector<2x4x1xf32> to vector<2x4x128xf32>
    %75 = vector.broadcast %cst_57 : f32 to vector<2x4x128xf32>
    %76 = arith.select %72, %74, %75 : vector<2x4x128xi1>, vector<2x4x128xf32>
    %77 = arith.addf %70, %76 : vector<2x4x128xf32>
    %c2_i32 = arith.constant 2 : i32
    %78 = vector.broadcast %c2_i32 : i32 to vector<2x4x128xi32>
    %79 = arith.cmpi eq, %64, %78 : vector<2x4x128xi32>
    %cst_58 = arith.constant 0.000000e+00 : f32
    %80 = vector.shape_cast %61 : vector<2x4x1xf32> to vector<2x4x1xf32>
    %81 = vector.broadcast %80 : vector<2x4x1xf32> to vector<2x4x128xf32>
    %82 = vector.broadcast %cst_58 : f32 to vector<2x4x128xf32>
    %83 = arith.select %79, %81, %82 : vector<2x4x128xi1>, vector<2x4x128xf32>
    %84 = arith.addf %77, %83 : vector<2x4x128xf32>
    %85 = vector.broadcast %63 : vector<2x4x1xf32> to vector<2x4x128xf32>
    %86 = arith.mulf %84, %85 : vector<2x4x128xf32>
    %c0_59 = arith.constant 0 : index
    %c0_60 = arith.constant 0 : index
    %c0_61 = arith.constant 0 : index
    %87 = vector.load %arg5[%c0_59, %c0_60, %c0_61] : memref<2x4x128xf32, #tpu.memory_space<vmem>>, vector<2x4x128xf32>
    tpu.vector_store %arg5[%c0_59, %c0_60, %c0_61], %86 {strides = array<i32>} : memref<2x4x128xf32, #tpu.memory_space<vmem>>, vector<2x4x128xf32>,
    return
  }
  func.func @transform_0(%arg0: i32) -> (i32, i32, i32, i32, i32) {
    %c0_i32 = arith.constant 0 : i32
    %c0_i32_0 = arith.constant 0 : i32
    %c0_i32_1 = arith.constant 0 : i32
    %c0_i32_2 = arith.constant 0 : i32
    %c0_i32_3 = arith.constant 0 : i32
    %c0_i32_4 = arith.constant 0 : i32
    return %c0_i32, %c0_i32_0, %c0_i32_1, %c0_i32_2, %c0_i32_3 : i32, i32, i32, i32, i32
  }
  func.func @transform_1(%arg0: i32) -> (i32, i32, i32, i32, i32) {
    %c0_i32 = arith.constant 0 : i32
    %c0_i32_0 = arith.constant 0 : i32
    %c0_i32_1 = arith.constant 0 : i32
    %c0_i32_2 = arith.constant 0 : i32
    %c0_i32_3 = arith.constant 0 : i32
    %c0_i32_4 = arith.constant 0 : i32
    return %c0_i32, %c0_i32_0, %c0_i32_1, %c0_i32_2, %c0_i32_3 : i32, i32, i32, i32, i32
  }
  func.func @transform_2(%arg0: i32) -> (i32, i32, i32, i32) {
    %c0_i32 = arith.constant 0 : i32
    %c0_i32_0 = arith.constant 0 : i32
    %c0_i32_1 = arith.constant 0 : i32
    %c0_i32_2 = arith.constant 0 : i32
    %c0_i32_3 = arith.constant 0 : i32
    return %c0_i32, %c0_i32_0, %c0_i32_1, %c0_i32_2 : i32, i32, i32, i32
  }
  func.func @transform_3(%arg0: i32) -> (i32, i32, i32) {
    %c0_i32 = arith.constant 0 : i32
    %c0_i32_0 = arith.constant 0 : i32
    %c0_i32_1 = arith.constant 0 : i32
    %c0_i32_2 = arith.constant 0 : i32
    return %c0_i32, %c0_i32_0, %c0_i32_1 : i32, i32, i32
  }
  func.func @transform_4(%arg0: i32) -> (i32, i32, i32) {
    %c0_i32 = arith.constant 0 : i32
    %c0_i32_0 = arith.constant 0 : i32
    %c0_i32_1 = arith.constant 0 : i32
    %c0_i32_2 = arith.constant 0 : i32
    return %c0_i32, %c0_i32_0, %c0_i32_1 : i32, i32, i32
  }
}

</mosaic_0001>

<bundles_post_ra>
// kernel: tpu_custom_call.1
= control target key start
LH: loop header
LB: loop body
LE: loop exit
PB: predicated region body
PF: predicated region fallthrough
CT: control target
= control target key end

     0   :  { %v811_v2 = vmov 0   ;;  %s1071_s0 = inlined_call_operand.vmem [shape: f32[4,2,1,1,64], index: 0, kind: input, shape index: {}]   ;;  %s1072_s1 = inlined_call_operand.vmem [shape: f32[4,1,4,8,1], index: 1, kind: input, shape index: {}]   ;;  %s1073_s2 = inlined_call_operand.vmem [shape: f32[2,1,1,64], index: 2, kind: input, shape index: {}]   ;;  %s1074_s3 = inlined_call_operand.vmem [shape: f32[1,1,8], index: 3, kind: input, shape index: {}]   ;;  %s1075_s4 = inlined_call_operand.hbm [shape: f32[2,4,128], index: 4, kind: output, shape index: {}]  }
   0x1   :  { %v735_v0 = vld [vmem:[%s1072_s1 + $0x20] sm:$0xff]  ;;  %768 = vset.pattern.permute.xlu1 %v811_v2  ;;  %767 = vset.pattern.permute.xlu0 %v811_v2  ;;  %v736_v3 = vld [vmem:[%s1072_s1 + $0x28] sm:$0xff] }
   0x2   :  { %v18_v1 = vld [vmem:[%s1072_s1] sm:$0xff]  ;;  %74 = vperm.xlu1 %768, %v735_v0   ;;  %v19_v4 = vld [vmem:[%s1072_s1 + $0x8] sm:$0xff] }
   0x3   :  { %26 = vperm.xlu0 %767, %v18_v1  }
   0x6   :  { %79 = vperm.xlu1 %768, %v736_v3  }
   0x7   :  { %31 = vperm.xlu0 %767, %v19_v4  }
   0x8   :  { %9 = vsyncpa [#allocation3], 0  ;;  %v737_v5 = vld [vmem:[%s1072_s1 + $0x30] sm:$0xff]  ;;  %v738_v7 = vld [vmem:[%s1072_s1 + $0x38] sm:$0xff]  ;;  %vm232_vm0 = vcmask 523264   ;;  %vm436_vm1 = vcmask 1041409  }
   0x9   :  { %v20_v6 = vld [vmem:[%s1072_s1 + $0x10] sm:$0xff]  ;;  %v21_v8 = vld [vmem:[%s1072_s1 + $0x18] sm:$0xff]  ;;  %v744_v9 = vld [vmem:[%s1072_s1 + $0x48] sm:$0xff]  ;;  %vm438_vm2 = vcmask 1042434   ;;  %vm440_vm3 = vcmask 1043459   ;;  %vm447_vm4 = vcmask 60416  }
   0xa   :  { %84 = vperm.xlu1 %768, %v737_v5   ;;  %v743_v10 = vld [vmem:[%s1072_s1 + $0x40] sm:$0xff]  ;;  %v746_v11 = vld [vmem:[%s1072_s1 + $0x58] sm:$0xff]  ;;  %v745_v12 = vld [vmem:[%s1072_s1 + $0x50] sm:$0xff] }
   0xb   :  { %36 = vperm.xlu0 %767, %v20_v6   ;;  %v752_v13 = vld [vmem:[%s1072_s1 + $0x68] sm:$0xff]  ;;  %v751_v14 = vld [vmem:[%s1072_s1 + $0x60] sm:$0xff]  ;;  %v754_v15 = vld [vmem:[%s1072_s1 + $0x78] sm:$0xff] }
   0xc   :  { %v753_v16 = vld [vmem:[%s1072_s1 + $0x70] sm:$0xff]  ;;  %v741_v25 = vld [vmem:[%s1071_s0 + $0x2] ss:$0 sm:$0xff]  ;;  %v733_v26 = vld [vmem:[%s1071_s0] ss:$0 sm:$0xff] }
   0xd   :  { %v749_v29 = vld [vmem:[%s1071_s0 + $0x4] ss:$0 sm:$0xff]  ;;  %v742_v30 = vld [vmem:[%s1071_s0 + $0x3] ss:$0 sm:$0xff]  ;;  %v734_v34 = vld [vmem:[%s1071_s0 + $0x1] ss:$0 sm:$0xff] }
   0xe   :  { %89 = vperm.xlu1 %768, %v738_v7   ;;  %v750_v40 = vld [vmem:[%s1071_s0 + $0x5] ss:$0 sm:$0xff]  ;;  %v757_v46 = vld [vmem:[%s1071_s0 + $0x6] ss:$0 sm:$0xff]  ;;  %v758_v50 = vld [vmem:[%s1071_s0 + $0x7] ss:$0 sm:$0xff] }
   0xf   :  { %41 = vperm.xlu0 %767, %v21_v8  }
  0x12   :  { %135 = vperm.xlu1 %768, %v744_v9  }
  0x13   :  { %130 = vperm.xlu0 %767, %v743_v10  }
  0x16   :  { %145 = vperm.xlu1 %768, %v746_v11  }
  0x17   :  { %140 = vperm.xlu0 %767, %v745_v12  }
  0x1a   :  { %191 = vperm.xlu1 %768, %v752_v13  }
  0x1b   :  { %186 = vperm.xlu0 %767, %v751_v14  }
  0x1e   :  { %201 = vperm.xlu1 %768, %v754_v15  }
  0x1f   :  { %196 = vperm.xlu0 %767, %v753_v16  }
  0x7d   :  { %v75_v17 = vpop.permute.xlu1 %74 }
  0x7e   :  { %v27_v18 = vpop.permute.xlu0 %26  ;;  %v104_v33 = vmul.f32 %v741_v25, %v75_v17  ;;  %v108_v39 = vmul.f32 %v742_v30, %v75_v17 }
  0x7f   :  { %v56_v35 = vmul.f32 %v733_v26, %v27_v18  ;;  %v60_v42 = vmul.f32 %v734_v34, %v27_v18 }
  0x81   :  { %v80_v19 = vpop.permute.xlu1 %79  ;;  %v112_v47 = vadd.f32 %v104_v33, %v56_v35  ;;  %v116_v61 = vadd.f32 %v108_v39, %v60_v42 }
  0x82   :  { %v32_v20 = vpop.permute.xlu0 %31  ;;  %v105_v31 = vmul.f32 %v741_v25, %v80_v19  ;;  %v109_v43 = vmul.f32 %v742_v30, %v80_v19 }
  0x83   :  { %v57_v32 = vmul.f32 %v733_v26, %v32_v20  ;;  %v61_v44 = vmul.f32 %v734_v34, %v32_v20 }
  0x85   :  { %v85_v21 = vpop.permute.xlu1 %84  ;;  %v113_v45 = vadd.f32 %v105_v31, %v57_v32  ;;  %v117_v62 = vadd.f32 %v109_v43, %v61_v44 }
  0x86   :  { %v37_v22 = vpop.permute.xlu0 %36  ;;  %v106_v48 = vmul.f32 %v741_v25, %v85_v21  ;;  %v110_v0 = vmul.f32 %v742_v30, %v85_v21 }
  0x87   :  { %v58_v49 = vmul.f32 %v733_v26, %v37_v22  ;;  %v62_v4 = vmul.f32 %v734_v34, %v37_v22 }
  0x89   :  { %v888_v23 = vpop.permute.xlu1 %89  ;;  %v114_v1 = vadd.f32 %v106_v48, %v58_v49  ;;  %v118_v22 = vadd.f32 %v110_v0, %v62_v4 }
  0x8a   :  { %v890_v24 = vpop.permute.xlu0 %41  ;;  %v107_v51 = vmul.f32 %v741_v25, %v888_v23  ;;  %v111_v25 = vmul.f32 %v742_v30, %v888_v23 }
  0x8b   :  { %v59_v52 = vmul.f32 %v733_v26, %v890_v24  ;;  %v63_v26 = vmul.f32 %v734_v34, %v890_v24 }
  0x8d   :  { %v136_v27 = vpop.permute.xlu1 %135  ;;  %v115_v10 = vadd.f32 %v107_v51, %v59_v52 }
  0x8e   :  { %v131_v28 = vpop.permute.xlu0 %130  ;;  %v161_v36 = vmul.f32 %v749_v29, %v136_v27  ;;  %v165_v5 = vmul.f32 %v750_v40, %v136_v27 }
  0x8f   :  { %v160_v41 = vmul.f32 %v749_v29, %v131_v28  ;;  %v164_v54 = vmul.f32 %v750_v40, %v131_v28 }
  0x90   :  { %v169_v53 = vadd.f32 %v161_v36, %v113_v45  ;;  %v173_v19 = vadd.f32 %v165_v5, %v117_v62  ;;  %v119_v36 = vadd.f32 %v111_v25, %v63_v26 }
  0x91   :  { %v146_v37 = vpop.permute.xlu1 %145  ;;  %v168_v57 = vadd.f32 %v160_v41, %v112_v47  ;;  %v172_v6 = vadd.f32 %v164_v54, %v116_v61 }
  0x92   :  { %v141_v38 = vpop.permute.xlu0 %140  ;;  %v163_v7 = vmul.f32 %v749_v29, %v146_v37  ;;  %v167_v33 = vmul.f32 %v750_v40, %v146_v37 }
  0x93   :  { %v162_v58 = vmul.f32 %v749_v29, %v141_v38  ;;  %v166_v21 = vmul.f32 %v750_v40, %v141_v38 }
  0x94   :  { %v171_v20 = vadd.f32 %v163_v7, %v115_v10  ;;  %v175_v34 = vadd.f32 %v167_v33, %v119_v36 }
  0x95   :  { %v192_v55 = vpop.permute.xlu1 %191  ;;  %v170_v11 = vadd.f32 %v162_v58, %v114_v1  ;;  %v174_v35 = vadd.f32 %v166_v21, %v118_v22 }
  0x96   :  { %v187_v56 = vpop.permute.xlu0 %186  ;;  %v217_v59 = vmul.f32 %v757_v46, %v192_v55  ;;  %v221_v12 = vmul.f32 %v758_v50, %v192_v55 }
  0x97   :  { %v216_v60 = vmul.f32 %v757_v46, %v187_v56  ;;  %v220_v63 = vmul.f32 %v758_v50, %v187_v56 }
  0x98   :  { %v918_v2 = vadd.f32 %v217_v59, %v169_v53  ;;  %v936_v31 = vadd.f32 %v221_v12, %v173_v19 }
  0x99   :  { %v920_v3 = vadd.f32 %v216_v60, %v168_v57  ;;  %v202_v8 = vpop.permute.xlu1 %201  ;;  %v926_v17 = vadd.f32 %v220_v63, %v172_v6 }
  0x9a   :  { %v197_v9 = vpop.permute.xlu0 %196  ;;  %v219_v14 = vmul.f32 %v757_v46, %v202_v8  ;;  %v236_v15 = vsel %vm232_vm0, %v918_v2, -inf  ;;  %v223_v38 = vmul.f32 %v758_v50, %v202_v8  ;;  %v248_v23 = vsel %vm232_vm0, %v936_v31, -inf }
  0x9b   :  { %v218_v13 = vmul.f32 %v757_v46, %v197_v9  ;;  %v233_v16 = vsel %vm232_vm0, %v920_v3, -inf  ;;  %237 = vmax.xlane.f32.xlu1 %v236_v15  ;;  %v222_v28 = vmul.f32 %v758_v50, %v197_v9  ;;  %v245_v29 = vsel %vm232_vm0, %v926_v17, -inf }
  0x9c   :  { %234 = vmax.xlane.f32.xlu0 %v233_v16  ;;  %v938_v32 = vadd.f32 %v219_v14, %v171_v20  ;;  %v948_v41 = vadd.f32 %v223_v38, %v175_v34 }
  0x9d   :  { %v928_v18 = vadd.f32 %v218_v13, %v170_v11  ;;  %v944_v30 = vadd.f32 %v222_v28, %v174_v35 }
  0x9e   :  { %v242_v24 = vsel %vm232_vm0, %v938_v32, -inf  ;;  %v254_v37 = vsel %vm232_vm0, %v948_v41, -inf }
  0x9f   :  { %v239_v27 = vsel %vm232_vm0, %v928_v18, -inf  ;;  %v251_v39 = vsel %vm232_vm0, %v944_v30, -inf }
  0xa0   :  { %246 = vmax.xlane.f32.xlu0 %v245_v29  ;;  %240 = vmax.xlane.f32.xlu1 %v239_v27 }
  0xa4   :  { %249 = vmax.xlane.f32.xlu0 %v248_v23  ;;  %243 = vmax.xlane.f32.xlu1 %v242_v24 }
  0xa8   :  { %252 = vmax.xlane.f32.xlu0 %v251_v39 }
  0xac   :  { %255 = vmax.xlane.f32.xlu0 %v254_v37 }
 0x124   :  { %v238_v40 = vpop.xlane.xlu1 %237 }
 0x125   :  { %v235_v42 = vpop.xlane.xlu0 %234  ;;  %v263_v43 = vrot.slane %v238_v40, 4 }
 0x126   :  { %v257_v44 = vrot.slane %v235_v42, 4 }
 0x127   :  { %v264_v45 = vmax.f32 %v238_v40, %v263_v43 }
 0x128   :  { %v258_v46 = vmax.f32 %v235_v42, %v257_v44 }
 0x129   :  { %v241_v47 = vpop.xlane.xlu1 %240  ;;  %v247_v48 = vpop.xlane.xlu0 %246  ;;  %v265_v49 = vrot.slane %v264_v45, 2 }
 0x12a   :  { %v259_v50 = vrot.slane %v258_v46, 2  ;;  %v269_v51 = vrot.slane %v241_v47, 4  ;;  %v281_v52 = vrot.slane %v247_v48, 4 }
 0x12b   :  { %v266_v53 = vmax.f32 %v264_v45, %v265_v49 }
 0x12c   :  { %v260_v54 = vmax.f32 %v258_v46, %v259_v50  ;;  %v270_v55 = vmax.f32 %v241_v47, %v269_v51  ;;  %v282_v56 = vmax.f32 %v247_v48, %v281_v52 }
 0x12d   :  { %v244_v57 = vpop.xlane.xlu1 %243  ;;  %v250_v58 = vpop.xlane.xlu0 %249  ;;  %v267_v59 = vrot.slane %v266_v53, 1 }
 0x12e   :  { %v261_v60 = vrot.slane %v260_v54, 1  ;;  %v271_v61 = vrot.slane %v270_v55, 2  ;;  %v283_v62 = vrot.slane %v282_v56, 2  ;;  %v275_v63 = vrot.slane %v244_v57, 4 }
 0x12f   :  { %v287_v0 = vrot.slane %v250_v58, 4  ;;  %v268_v1 = vmax.f32 %v266_v53, %v267_v59 }
 0x130   :  { %v262_v4 = vmax.f32 %v260_v54, %v261_v60  ;;  %v272_v5 = vmax.f32 %v270_v55, %v271_v61  ;;  %v284_v6 = vmax.f32 %v282_v56, %v283_v62  ;;  %v276_v7 = vmax.f32 %v244_v57, %v275_v63 }
 0x131   :  { %v288_v8 = vmax.f32 %v250_v58, %v287_v0  ;;  %v253_v9 = vpop.xlane.xlu0 %252  ;;  %v306_v10 = vsub.f32 %v918_v2, %v268_v1  ;;  %v760_v0 = vld [vmem:[%s1073_s2] ss:$0 sm:$0xff] }
 0x132   :  { %v305_v11 = vsub.f32 %v920_v3, %v262_v4  ;;  %v273_v12 = vrot.slane %v272_v5, 1  ;;  %v285_v13 = vrot.slane %v284_v6, 1  ;;  %v277_v14 = vrot.slane %v276_v7, 2 }
 0x133   :  { %v289_v15 = vrot.slane %v288_v8, 2  ;;  %v293_v16 = vrot.slane %v253_v9, 4  ;;  %v315_v19 = vmul.f32 1.442695, %v306_v10 }
 0x134   :  { %v313_v20 = vmul.f32 1.442695, %v305_v11  ;;  %v274_v21 = vmax.f32 %v272_v5, %v273_v12  ;;  %v286_v22 = vmax.f32 %v284_v6, %v285_v13  ;;  %v278_v25 = vmax.f32 %v276_v7, %v277_v14  ;;  %v761_v12 = vld [vmem:[%s1073_s2 + $0x1] ss:$0 sm:$0xff]  ;;  %s812_s2 = smov [#allocation2]  }
 0x135   :  { %v290_v26 = vmax.f32 %v288_v8, %v289_v15  ;;  %v294_v27 = vmax.f32 %v253_v9, %v293_v16  ;;  %v256_v28 = vpop.xlane.xlu0 %255  ;;  %769 = vpow2.f32 %v315_v19  ;;  %v762_v9 = vld [vmem:[%s1074_s3] ss:$0 sm:$0xff]  ;;  %s722_s3 = sshll.u32 %s812_s2, 4  ;;  %s723_s3 = int_to_ptr.vmem [resolvable:$true] %s722_s3 }
 0x136   :  { %v307_v29 = vsub.f32 %v928_v18, %v274_v21  ;;  %v309_v2 = vsub.f32 %v926_v17, %v286_v22  ;;  %v299_v33 = vrot.slane %v256_v28, 4  ;;  %771 = vpow2.f32 %v313_v20  ;;  %s789_s15 = scalar_lea.vmem %s723_s3, 128  ;;  %p794_p1 = scmp.lt.s32.totalorder %s723_s3, %s723_s3 }
 0x137   :  { %v279_v3 = vrot.slane %v278_v25, 1  ;;  %v291_v35 = vrot.slane %v290_v26, 1  ;;  %v295_v36 = vrot.slane %v294_v27, 2  ;;  %p790_p0 = scmp.ne.s32.totalorder %s723_s3, %s789_s15  ;;  %p795_p2 = scmp.lt.s32.totalorder %s789_s15, %s789_s15 }
 0x138   :  { %v321_v38 = vmul.f32 1.442695, %v309_v2  ;;  %v300_v23 = vmax.f32 %v256_v28, %v299_v33  ;;  %v317_v24 = vmul.f32 1.442695, %v307_v29 }
 0x139   :  { %v280_v34 = vmax.f32 %v278_v25, %v279_v3  ;;  %v292_v39 = vmax.f32 %v290_v26, %v291_v35  ;;  %v296_v37 = vmax.f32 %v294_v27, %v295_v36  ;;  %p796_p3 = por %p795_p2, %p794_p1 }
 0x13a   :  { %v301_v40 = vrot.slane %v300_v23, 2  ;;  %773 = vpow2.f32 %v321_v38 }
 0x13b   :  { %v308_v42 = vsub.f32 %v938_v32, %v280_v34  ;;  %v310_v43 = vsub.f32 %v936_v31, %v292_v39  ;;  %v297_v18 = vrot.slane %v296_v37, 1  ;;  %775 = vpow2.f32 %v317_v24  ;;  %p797_p4 = pnand %p796_p3, %p790_p0 }
 0x13c   :  { %v302_v44 = vmax.f32 %v300_v23, %v301_v40 }
 0x13d   :  { %v319_v17 = vmul.f32 1.442695, %v308_v42  ;;  %v323_v45 = vmul.f32 1.442695, %v310_v43  ;;  %v298_v46 = vmax.f32 %v296_v37, %v297_v18 }
 0x13e   :  { %v303_v47 = vrot.slane %v302_v44, 1 }
 0x13f   :  { %v311_v48 = vsub.f32 %v944_v30, %v298_v46  ;;  %777 = vpow2.f32 %v323_v45 }
 0x140   :  { %v304_v49 = vmax.f32 %v302_v44, %v303_v47  ;;  %779 = vpow2.f32 %v319_v17 }
 0x141   :  { %v325_v50 = vmul.f32 1.442695, %v311_v48 }
 0x142   :  { %v312_v51 = vsub.f32 %v948_v41, %v304_v49  ;;  %v770_v52 = vpop.eup %769 }
 0x143   :  { %781 = vpow2.f32 %v325_v50  ;;  %v772_v32 = vpop.eup %771  ;;  %v335_v31 = vsel %vm232_vm0, %v770_v52, 0.0  ;;  %v363_v6 = vmul.f32 %v770_v52, %v760_v0  ;;  %v461_v14 = vmul.f32 %v770_v52, %v761_v12 }
 0x144   :  { %v327_v53 = vmul.f32 1.442695, %v312_v51  ;;  %336 = vadd.xlane.f32.xlu0 %v335_v31  ;;  %v332_v54 = vsel %vm232_vm0, %v772_v32, 0.0  ;;  %v362_v4 = vmul.f32 %v772_v32, %v760_v0  ;;  %v460_v35 = vmul.f32 %v772_v32, %v761_v12 }
 0x145   :  { %333 = vadd.xlane.f32.xlu1 %v332_v54  ;;  %v373_v7 = vsel %vm232_vm0, %v363_v6, 0.0  ;;  %v471_v15 = vsel %vm232_vm0, %v461_v14, 0.0 }
 0x146   :  { %783 = vpow2.f32 %v327_v53  ;;  %v370_v5 = vsel %vm232_vm0, %v362_v4, 0.0  ;;  %v468_v38 = vsel %vm232_vm0, %v460_v35, 0.0 }
 0x147   :  { %v774_v55 = vpop.eup %773 }
 0x148   :  { %v344_v30 = vsel %vm232_vm0, %v774_v55, 0.0  ;;  %v776_v56 = vpop.eup %775  ;;  %v366_v8 = vmul.f32 %v774_v55, %v760_v0  ;;  %v464_v16 = vmul.f32 %v774_v55, %v761_v12 }
 0x149   :  { %345 = vadd.xlane.f32.xlu1 %v344_v30  ;;  %v338_v58 = vsel %vm232_vm0, %v776_v56, 0.0  ;;  %v364_v22 = vmul.f32 %v776_v56, %v760_v0  ;;  %v462_v28 = vmul.f32 %v776_v56, %v761_v12 }
 0x14a   :  { %v382_v10 = vsel %vm232_vm0, %v366_v8, 0.0  ;;  %v480_v19 = vsel %vm232_vm0, %v464_v16, 0.0 }
 0x14b   :  { %v376_v25 = vsel %vm232_vm0, %v364_v22, 0.0  ;;  %v474_v29 = vsel %vm232_vm0, %v462_v28, 0.0 }
 0x14c   :  { %v778_v57 = vpop.eup %777 }
 0x14d   :  { %v780_v41 = vpop.eup %779  ;;  %339 = vadd.xlane.f32.xlu1 %v338_v58  ;;  %v347_v59 = vsel %vm232_vm0, %v778_v57, 0.0  ;;  %v367_v11 = vmul.f32 %v778_v57, %v760_v0  ;;  %v465_v20 = vmul.f32 %v778_v57, %v761_v12  ;;  %v402_v58 = vlaneseq }
 0x14e   :  { %348 = vadd.xlane.f32.xlu0 %v347_v59  ;;  %v341_v61 = vsel %vm232_vm0, %v780_v41, 0.0  ;;  %v365_v3 = vmul.f32 %v780_v41, %v760_v0  ;;  %v463_v24 = vmul.f32 %v780_v41, %v761_v12 }
 0x14f   :  { %v385_v13 = vsel %vm232_vm0, %v367_v11, 0.0  ;;  %v483_v21 = vsel %vm232_vm0, %v465_v20, 0.0  ;;  %v993_v59 = vand.u32 127, %v402_v58 }
 0x150   :  { %v782_v60 = vpop.eup %781  ;;  %v379_v36 = vsel %vm232_vm0, %v365_v3, 0.0  ;;  %v477_v39 = vsel %vm232_vm0, %v463_v24, 0.0 }
 0x151   :  { %v350_v62 = vsel %vm232_vm0, %v782_v60, 0.0  ;;  %342 = vadd.xlane.f32.xlu1 %v341_v61  ;;  %v368_v26 = vmul.f32 %v782_v60, %v760_v0  ;;  %v466_v2 = vmul.f32 %v782_v60, %v761_v12  ;;  %v405_v60 = vshrl.u32 %v402_v58, 7 }
 0x152   :  { %351 = vadd.xlane.f32.xlu0 %v350_v62  ;;  %vm703_vm5 = vcmp.eq.s32.totalorder %v993_v59, 1  ;;  %vm700_vm6 = vcmp.eq.s32.totalorder %v993_v59, 0  ;;  %vm708_vm7 = vcmp.eq.s32.totalorder %v993_v59, 2 }
 0x153   :  { %v784_v63 = vpop.eup %783  ;;  %v388_v27 = vsel %vm232_vm0, %v368_v26, 0.0  ;;  %v486_v33 = vsel %vm232_vm0, %v466_v2, 0.0  ;;  %v998_v62 = vsub.s32 %v993_v59, %v405_v60 }
 0x154   :  { %v353_v1 = vsel %vm232_vm0, %v784_v63, 0.0  ;;  %v369_v23 = vmul.f32 %v784_v63, %v760_v0  ;;  %v467_v37 = vmul.f32 %v784_v63, %v761_v12 }
 0x156   :  { %354 = vadd.xlane.f32.xlu0 %v353_v1  ;;  %v391_v34 = vsel %vm232_vm0, %v369_v23, 0.0  ;;  %v489_v40 = vsel %vm232_vm0, %v467_v37, 0.0 }
 0x15a   :  { %371 = vadd.xlane.f32.xlu0 %v370_v5 }
 0x15e   :  { %374 = vadd.xlane.f32.xlu0 %v373_v7 }
 0x162   :  { %383 = vadd.xlane.f32.xlu0 %v382_v10  ;;  %607 = vbcast.lane.b32.xlu1 %v762_v9, 256 }
 0x166   :  { %386 = vadd.xlane.f32.xlu0 %v385_v13 }
 0x16a   :  { %472 = vadd.xlane.f32.xlu0 %v471_v15 }
 0x16e   :  { %481 = vadd.xlane.f32.xlu0 %v480_v19 }
 0x172   :  { %484 = vadd.xlane.f32.xlu0 %v483_v21 }
 0x176   :  { %377 = vadd.xlane.f32.xlu0 %v376_v25 }
 0x17a   :  { %389 = vadd.xlane.f32.xlu0 %v388_v27 }
 0x17e   :  { %475 = vadd.xlane.f32.xlu0 %v474_v29 }
 0x182   :  { %487 = vadd.xlane.f32.xlu0 %v486_v33 }
 0x186   :  { %380 = vadd.xlane.f32.xlu0 %v379_v36  ;;  %469 = vadd.xlane.f32.xlu1 %v468_v38 }
 0x18a   :  { %392 = vadd.xlane.f32.xlu0 %v391_v34  ;;  %478 = vadd.xlane.f32.xlu1 %v477_v39 }
 0x18e   :  { %490 = vadd.xlane.f32.xlu0 %v489_v40 }
 0x1cd   :  { %v337_v18 = vpop.xlane.xlu0 %336 }
 0x1ce   :  { %v334_v42 = vpop.xlane.xlu1 %333  ;;  %v561_v1 = vrot.slane %v337_v18, %v998_v62 }
 0x1cf   :  { %v557_v0 = vrot.slane %v334_v42, %v998_v62 }
 0x1d1   :  { %v586_v7 = vsel %vm436_vm1, %v561_v1, %v557_v0 }
 0x1d2   :  { %v346_v43 = vpop.xlane.xlu1 %345 }
 0x1d3   :  { %v573_v15 = vrot.slane %v346_v43, %v998_v62 }
 0x1d6   :  { %v340_v44 = vpop.xlane.xlu1 %339 }
 0x1d7   :  { %v349_v17 = vpop.xlane.xlu0 %348  ;;  %v565_v4 = vrot.slane %v340_v44, %v998_v62 }
 0x1d8   :  { %v577_v13 = vrot.slane %v349_v17, %v998_v62 }
 0x1d9   :  { %v587_v9 = vsel %vm438_vm2, %v565_v4, %v586_v7 }
 0x1da   :  { %v343_v45 = vpop.xlane.xlu1 %342  ;;  %v589_v25 = vsel %vm436_vm1, %v577_v13, %v573_v15 }
 0x1db   :  { %v352_v46 = vpop.xlane.xlu0 %351  ;;  %v569_v6 = vrot.slane %v343_v45, %v998_v62 }
 0x1dc   :  { %v581_v14 = vrot.slane %v352_v46, %v998_v62 }
 0x1dd   :  { %v588_v10 = vsel %vm440_vm3, %v569_v6, %v587_v9 }
 0x1de   :  { %v608_v47 = vpop.permute.xlu1 %607  ;;  %v594_v12 = vsel %vm447_vm4, %v588_v10, 0.0  ;;  %v590_v26 = vsel %vm438_vm2, %v581_v14, %v589_v25 }
 0x1df   :  { %v355_v48 = vpop.xlane.xlu0 %354  ;;  %v610_v49 = vmul.f32 %v608_v47, %v334_v42  ;;  %v611_v50 = vmul.f32 %v608_v47, %v337_v18  ;;  %v614_v52 = vmul.f32 %v608_v47, %v346_v43  ;;  %v612_v32 = vmul.f32 %v608_v47, %v340_v44 }
 0x1e0   :  { %v613_v31 = vmul.f32 %v608_v47, %v343_v45  ;;  %v615_v54 = vmul.f32 %v608_v47, %v349_v17  ;;  %v616_v30 = vmul.f32 %v608_v47, %v352_v46  ;;  %v617_v56 = vmul.f32 %v608_v47, %v355_v48 }
 0x1e1   :  { %627 = vperm.xlu1 %768, %v610_v49   ;;  %630 = vperm.xlu0 %767, %v611_v50   ;;  %v585_v16 = vrot.slane %v355_v48, %v998_v62 }
 0x1e3   :  { %v372_v51 = vpop.xlane.xlu0 %371  ;;  %v591_v2 = vsel %vm440_vm3, %v585_v16, %v590_v26 }
 0x1e4   :  { %v407_v21 = vrot.slane %v372_v51, %v998_v62  ;;  %v597_v18 = vsel %vm447_vm4, %v591_v2, 0.0 }
 0x1e5   :  { %639 = vperm.xlu1 %768, %v614_v52   ;;  %633 = vperm.xlu0 %767, %v612_v32  }
 0x1e7   :  { %v375_v53 = vpop.xlane.xlu0 %374 }
 0x1e8   :  { %v411_v19 = vrot.slane %v375_v53, %v998_v62 }
 0x1e9   :  { %636 = vperm.xlu0 %767, %v613_v31   ;;  %642 = vperm.xlu1 %768, %v615_v54  }
 0x1ea   :  { %v437_v27 = vsel %vm436_vm1, %v411_v19, %v407_v21 }
 0x1eb   :  { %v384_v55 = vpop.xlane.xlu0 %383 }
 0x1ec   :  { %v423_v24 = vrot.slane %v384_v55, %v998_v62 }
 0x1ed   :  { %645 = vperm.xlu1 %768, %v616_v30  }
 0x1ef   :  { %v387_v57 = vpop.xlane.xlu0 %386 }
 0x1f0   :  { %v427_v33 = vrot.slane %v387_v57, %v998_v62 }
 0x1f1   :  { %648 = vperm.xlu1 %768, %v617_v56  }
 0x1f2   :  { %v442_v44 = vsel %vm436_vm1, %v427_v33, %v423_v24 }
 0x1f3   :  { %v473_v41 = vpop.xlane.xlu0 %472 }
 0x1f4   :  { %v507_v3 = vrot.slane %v473_v41, %v998_v62 }
 0x1f7   :  { %v995_v61 = vpop.xlane.xlu0 %481 }
 0x1f8   :  { %v519_v50 = vrot.slane %v995_v61, %v998_v62 }
 0x1fb   :  { %v485_v63 = vpop.xlane.xlu0 %484 }
 0x1fc   :  { %v523_v17 = vrot.slane %v485_v63, %v998_v62 }
 0x1fe   :  { %v535_v54 = vsel %vm436_vm1, %v523_v17, %v519_v50 }
 0x1ff   :  { %v378_v5 = vpop.xlane.xlu0 %377 }
 0x200   :  { %v415_v22 = vrot.slane %v378_v5, %v998_v62 }
 0x202   :  { %v439_v23 = vsel %vm438_vm2, %v415_v22, %v437_v27 }
 0x203   :  { %v390_v8 = vpop.xlane.xlu0 %389 }
 0x204   :  { %v431_v38 = vrot.slane %v390_v8, %v998_v62 }
 0x206   :  { %v443_v48 = vsel %vm438_vm2, %v431_v38, %v442_v44 }
 0x207   :  { %v476_v11 = vpop.xlane.xlu0 %475 }
 0x208   :  { %595 = vadd.xlane.f32.xlu0 %v594_v12  ;;  %v511_v37 = vrot.slane %v476_v11, %v998_v62 }
 0x20b   :  { %v488_v20 = vpop.xlane.xlu0 %487 }
 0x20c   :  { %v527_v47 = vrot.slane %v488_v20, %v998_v62 }
 0x20e   :  { %v536_v30 = vsel %vm438_vm2, %v527_v47, %v535_v54 }
 0x20f   :  { %v381_v28 = vpop.xlane.xlu0 %380  ;;  %v470_v29 = vpop.xlane.xlu1 %469 }
 0x210   :  { %v419_v35 = vrot.slane %v381_v28, %v998_v62  ;;  %v503_v36 = vrot.slane %v470_v29, %v998_v62 }
 0x212   :  { %v532_v34 = vsel %vm436_vm1, %v507_v3, %v503_v36  ;;  %v441_v39 = vsel %vm440_vm3, %v419_v35, %v439_v23 }
 0x213   :  { %v393_v40 = vpop.xlane.xlu0 %392  ;;  %v479_v42 = vpop.xlane.xlu1 %478  ;;  %v448_v43 = vsel %vm447_vm4, %v441_v39, 0.0  ;;  %v533_v49 = vsel %vm438_vm2, %v511_v37, %v532_v34 }
 0x214   :  { %v435_v45 = vrot.slane %v393_v40, %v998_v62  ;;  %v515_v46 = vrot.slane %v479_v42, %v998_v62  ;;  %449 = vadd.xlane.f32.xlu0 %v448_v43 }
 0x215   :  { %598 = vadd.xlane.f32.xlu1 %v597_v18 }
 0x216   :  { %v444_v51 = vsel %vm440_vm3, %v435_v45, %v443_v48  ;;  %v534_v52 = vsel %vm440_vm3, %v515_v46, %v533_v49 }
 0x217   :  { %v491_v32 = vpop.xlane.xlu0 %490  ;;  %v451_v53 = vsel %vm447_vm4, %v444_v51, 0.0  ;;  %v540_v31 = vsel %vm447_vm4, %v534_v52, 0.0 }
 0x218   :  { %v531_v55 = vrot.slane %v491_v32, %v998_v62  ;;  %452 = vadd.xlane.f32.xlu0 %v451_v53 }
 0x219   :  { %541 = vadd.xlane.f32.xlu1 %v540_v31 }
 0x21a   :  { %v537_v56 = vsel %vm440_vm3, %v531_v55, %v536_v30 }
 0x21b   :  { %v543_v57 = vsel %vm447_vm4, %v537_v56, 0.0 }
 0x21c   :  { %544 = vadd.xlane.f32.xlu0 %v543_v57 }
 0x25c   :  { %v628_v58 = vpop.permute.xlu1 %627  ;;  %v631_v41 = vpop.permute.xlu0 %630 }
 0x25d   :  { %v653_v63 = vrot.slane %v628_v58, %v998_v62  ;;  %v657_v0 = vrot.slane %v631_v41, %v998_v62 }
 0x25f   :  { %v682_v6 = vsel %vm436_vm1, %v657_v0, %v653_v63 }
 0x260   :  { %v640_v60 = vpop.permute.xlu1 %639  ;;  %v634_v61 = vpop.permute.xlu0 %633 }
 0x261   :  { %v661_v1 = vrot.slane %v634_v61, %v998_v62  ;;  %v669_v14 = vrot.slane %v640_v60, %v998_v62 }
 0x263   :  { %v683_v8 = vsel %vm438_vm2, %v661_v1, %v682_v6 }
 0x264   :  { %v643_v4 = vpop.permute.xlu1 %642  ;;  %v637_v5 = vpop.permute.xlu0 %636 }
 0x265   :  { %v665_v7 = vrot.slane %v637_v5, %v998_v62  ;;  %v673_v12 = vrot.slane %v643_v4, %v998_v62 }
 0x267   :  { %v684_v9 = vsel %vm440_vm3, %v665_v7, %v683_v8  ;;  %v685_v16 = vsel %vm436_vm1, %v673_v12, %v669_v14 }
 0x268   :  { %v646_v10 = vpop.permute.xlu1 %645  ;;  %v690_v11 = vsel %vm447_vm4, %v684_v9, 0.0 }
 0x269   :  { %691 = vadd.xlane.f32.xlu1 %v690_v11  ;;  %v677_v13 = vrot.slane %v646_v10, %v998_v62 }
 0x26b   :  { %v686_v20 = vsel %vm438_vm2, %v677_v13, %v685_v16 }
 0x26c   :  { %v649_v15 = vpop.permute.xlu1 %648 }
 0x26d   :  { %v681_v19 = vrot.slane %v649_v15, %v998_v62 }
 0x26f   :  { %v687_v21 = vsel %vm440_vm3, %v681_v19, %v686_v20 }
 0x270   :  { %v693_v22 = vsel %vm447_vm4, %v687_v21, 0.0 }
 0x271   :  { %694 = vadd.xlane.f32.xlu0 %v693_v22 }
 0x291   :  { %v596_v25 = vpop.xlane.xlu0 %595 }
 0x292   :  { %785 = vrcp.f32 %v596_v25 }
 0x29d   :  { %v450_v27 = vpop.xlane.xlu0 %449 }
 0x29e   :  { %v599_v26 = vpop.xlane.xlu1 %598  ;;  %v701_v62 = vsel %vm700_vm6, %v450_v27, 0.0 }
 0x29f   :  { %787 = vrcp.f32 %v599_v26  ;;  %v786_v23 = vpop.eup %785 }
 0x2a1   :  { %v453_v29 = vpop.xlane.xlu0 %452 }
 0x2a2   :  { %v542_v28 = vpop.xlane.xlu1 %541  ;;  %v702_v39 = vsel %vm700_vm6, %v453_v29, 0.0 }
 0x2a3   :  { %v704_v2 = vsel %vm703_vm5, %v542_v28, 0.0 }
 0x2a4   :  { %v706_v33 = vadd.f32 %v704_v2, %v701_v62 }
 0x2a5   :  { %v545_v36 = vpop.xlane.xlu0 %544 }
 0x2a6   :  { %v705_v34 = vsel %vm703_vm5, %v545_v36, 0.0 }
 0x2a7   :  { %v707_v37 = vadd.f32 %v705_v34, %v702_v39 }
 0x2ac   :  { %v788_v18 = vpop.eup %787 }
 0x2f2   :  { %v692_v3 = vpop.xlane.xlu1 %691 }
 0x2f3   :  { %v709_v35 = vsel %vm708_vm7, %v692_v3, 0.0 }
 0x2f4   :  { %v711_v38 = vadd.f32 %v709_v35, %v706_v33 }
 0x2f6   :  { %v713_v24 = vmul.f32 %v786_v23, %v711_v38 }
 0x2f8   :  { %715 = vst [vmem:[#allocation2] sm:$0xf] %v713_v24 }
 0x2fa   :  { %v695_v40 = vpop.xlane.xlu0 %694 }
 0x2fb   :  { %v710_v42 = vsel %vm708_vm7, %v695_v40, 0.0 }
 0x2fc   :  { %v712_v43 = vadd.f32 %v710_v42, %v707_v37 }
 0x2fe   :  { %v714_v44 = vmul.f32 %v788_v18, %v712_v43 }
 0x300   :  { %716 = vst [vmem:[#allocation2 + $0x4] sm:$0xf] %v714_v44 }
 0x301   :  { %800 = shalt.err (!%p797_p4)
}
 0x302   :  { %s813_s16 = smov 64   ;;  %s814_s17 = smov 4  }
 0x303   :  { %728 = dma.vmem_to_hbm [thread:$0]  %s723_s3, 128, %s1075_s4, [#allocation3], %s813_s16, %s813_s16, %s814_s17  }
 0x304   :  { %809 = dma.done.wait [#allocation3], 128  }
 0x305   :  { %810 = vsyncadd [#allocation3], 4294967168 }
 0x306   :  { %732 = vsyncpa [#allocation3], 1 }

</bundles_post_ra>
